<compile_context>
chip_gen: v5e
topology: v5e:2x2
jax: 0.10.0
libtpu: 0.0.40
codegen_flags: <defaults>
</compile_context>

<pallas_src>
import jax
import jax.numpy as jnp
from jax.experimental import pallas as pl
from jax.experimental.pallas import tpu as pltpu
import numpy as np


def _gru_agg_kernel(xf_ref,     # [chunk*N, D_in] current time-chunk (time-major flattened)
                    wi_ref,     # [D_in, 3H]  fused input-hidden weights (r|z|n)
                    wh_ref,     # [H, 3H]     fused hidden-hidden weights (r|z|n)
                    bx_ref,     # [1, 3H]     fused biases (b_ir+b_hr | b_iz+b_hz | b_in)
                    bhn_ref,    # [1, H]      hidden bias of the n-gate (inside r*(...))
                    wfc_ref,    # [H, O]      output Linear weight (pre-transposed)
                    bfc_ref,    # [1, O]      output Linear bias
                    out_ref,    # [N, O]      written only on the last chunk
                    h_ref):     # VMEM scratch [N, H], persists across grid steps
    c = pl.program_id(0)
    n_chunks = pl.num_programs(0)

    H = wh_ref.shape[0]
    N = out_ref.shape[0]
    CHUNK = xf_ref.shape[0] // N

    @pl.when(c == 0)
    def _():
        h_ref[...] = jnp.zeros_like(h_ref)

    # Hoisted input projections for the whole chunk: ONE MXU matmul.
    # gates_x[t*N:(t+1)*N, :] == x_t @ W_i^T + (b_i (+ b_h for the r,z gates))
    gates_x = (jnp.dot(xf_ref[...], wi_ref[...],
                       preferred_element_type=jnp.float32)
               + bx_ref[...])                              # [chunk*N, 3H]

    wh = wh_ref[...]
    bhn = bhn_ref[...]
    h = h_ref[...]

    # Static unroll within the chunk -> only h @ W_h remains on the serial path,
    # static slices everywhere (LLO can overlap EUP sigmoid/tanh, VPU gate math
    # and the next step's MXU push).
    for t in range(CHUNK):
        gx = gates_x[t * N:(t + 1) * N, :]                 # [N, 3H]
        gh = jnp.dot(h, wh, preferred_element_type=jnp.float32)   # [N, 3H]
        # PyTorch GRU cell, gate order (r, z, n):
        r = jax.nn.sigmoid(gx[:, 0:H] + gh[:, 0:H])
        z = jax.nn.sigmoid(gx[:, H:2 * H] + gh[:, H:2 * H])
        n = jnp.tanh(gx[:, 2 * H:3 * H] + r * (gh[:, 2 * H:3 * H] + bhn))
        h = (1.0 - z) * n + z * h

    h_ref[...] = h

    @pl.when(c == n_chunks - 1)
    def _():
        # Output Linear head: summary = h_final @ W_fc^T + b_fc
        out_ref[...] = (jnp.dot(h, wfc_ref[...],
                                preferred_element_type=jnp.float32)
                        + bfc_ref[...]).astype(out_ref.dtype)


def init_params(key, input_dim, hidden_dim, output_dim):
    """PyTorch-style parameters, uniform(-1/sqrt(H), 1/sqrt(H))."""
    ks = jax.random.split(key, 14)
    bound = 1.0 / np.sqrt(hidden_dim)

    def u(k, shape):
        return jax.random.uniform(k, shape, jnp.float32, -bound, bound)

    return {
        # input-hidden weights per gate (r, z, n), PyTorch shape [H, D_in]
        "w_ir": u(ks[0], (hidden_dim, input_dim)),
        "w_iz": u(ks[1], (hidden_dim, input_dim)),
        "w_in": u(ks[2], (hidden_dim, input_dim)),
        # hidden-hidden weights per gate, [H, H]
        "w_hr": u(ks[3], (hidden_dim, hidden_dim)),
        "w_hz": u(ks[4], (hidden_dim, hidden_dim)),
        "w_hn": u(ks[5], (hidden_dim, hidden_dim)),
        # biases, [H]
        "b_ir": u(ks[6], (hidden_dim,)),
        "b_iz": u(ks[7], (hidden_dim,)),
        "b_in": u(ks[8], (hidden_dim,)),
        "b_hr": u(ks[9], (hidden_dim,)),
        "b_hz": u(ks[10], (hidden_dim,)),
        "b_hn": u(ks[11], (hidden_dim,)),
        # output Linear, PyTorch shape [O, H] and [O]
        "w_fc": u(ks[12], (output_dim, hidden_dim)),
        "b_fc": u(ks[13], (output_dim,)),
    }


def pack_params(params):
    """One-time packing of PyTorch-style params into the fused kernel layout."""
    # Fused gate weights: concat gates (r|z|n) along output dim, transpose to [in, 3H]
    w_i = jnp.concatenate(
        [params["w_ir"], params["w_iz"], params["w_in"]], axis=0).T  # [D_in, 3H]
    w_h = jnp.concatenate(
        [params["w_hr"], params["w_hz"], params["w_hn"]], axis=0).T  # [H, 3H]
    # Fused biases: r/z get both biases; n gets only b_in here (b_hn stays
    # separate because it lives inside the r*(...) term).
    b_x = jnp.concatenate(
        [params["b_ir"] + params["b_hr"],
         params["b_iz"] + params["b_hz"],
         params["b_in"]], axis=0)[None, :]                            # [1, 3H]
    return {
        "w_i": w_i.astype(jnp.float32),
        "w_h": w_h.astype(jnp.float32),
        "b_x": b_x.astype(jnp.float32),
        "b_hn": params["b_hn"][None, :].astype(jnp.float32),          # [1, H]
        "w_fc": params["w_fc"].T.astype(jnp.float32),                 # [H, O]
        "b_fc": params["b_fc"][None, :].astype(jnp.float32),          # [1, O]
        "hidden_dim": int(params["w_hr"].shape[0]),
        "output_dim": int(params["w_fc"].shape[0]),
    }


def _pick_time_chunk(T, N, D_in, *, max_unroll=64, vmem_budget_bytes=2 << 20):
    """Largest divisor of T that (a) keeps the unrolled inner loop short,
    (b) keeps the streamed x chunk within a VMEM budget (double-buffered by
    the pipeline), and (c) satisfies the (8,128)-sublane rule for the block."""
    if T <= max_unroll and T * N * D_in * 4 <= vmem_budget_bytes:
        return T
    for c in range(min(T, max_unroll), 0, -1):
        if T % c:
            continue
        if (c * N) % 8 != 0:          # block sublane dim must be a multiple of 8
            continue
        if c * N * D_in * 4 > vmem_budget_bytes:
            continue
        return c
    # Fallback: whole sequence in one block (only hit for pathological T / N).
    return T


def temporal_feature_aggregator(x, packed, *, time_chunk=None):
    """
    x: [N, T, D_in] or [N, T, 1, D_in] float32.
    packed: output of pack_params().
    Returns: [1, N, O, 1, 1] float32 (matches the PyTorch unsqueeze chain).
    """
    if x.ndim == 4 and x.shape[2] == 1:
        x = jnp.squeeze(x, axis=2)
    N, T, D_in = x.shape
    H = packed["hidden_dim"]
    O = packed["output_dim"]

    if time_chunk is None:
        time_chunk = _pick_time_chunk(T, N, D_in)
    assert T % time_chunk == 0, (T, time_chunk)
    num_chunks = T // time_chunk
    rows_per_chunk = time_chunk * N

    # Time-major, flattened to [T*N, D_in] (row = t*N + n) so each grid step's
    # block is a contiguous slab and the per-step gate slices are static.
    # One-time wrapper-side layout plumbing, not per-step compute.
    x_flat = jnp.transpose(x, (1, 0, 2)).reshape(T * N, D_in).astype(jnp.float32)

    grid_spec = pltpu.PrefetchScalarGridSpec(
        num_scalar_prefetch=0,
        grid=(num_chunks,),
        in_specs=[
            # streamed: one time-chunk of x per grid step (double-buffered DMA)
            pl.BlockSpec((rows_per_chunk, D_in), lambda c: (c, 0)),
            # resident: constant block index -> fetched once, kept in VMEM
            pl.BlockSpec((D_in, 3 * H), lambda c: (0, 0)),
            pl.BlockSpec((H, 3 * H), lambda c: (0, 0)),
            pl.BlockSpec((1, 3 * H), lambda c: (0, 0)),
            pl.BlockSpec((1, H), lambda c: (0, 0)),
            pl.BlockSpec((H, O), lambda c: (0, 0)),
            pl.BlockSpec((1, O), lambda c: (0, 0)),
        ],
        out_specs=pl.BlockSpec((N, O), lambda c: (0, 0)),
        scratch_shapes=[pltpu.VMEM((N, H), jnp.float32)],   # hidden-state carry
    )

    summary = pl.pallas_call(
        _gru_agg_kernel,
        out_shape=jax.ShapeDtypeStruct((N, O), jnp.float32),
        grid_spec=grid_spec,
        compiler_params=pltpu.CompilerParams(
            dimension_semantics=("arbitrary",)),   # time recurrence is sequential
    )(x_flat,
      packed["w_i"], packed["w_h"],
      packed["b_x"], packed["b_hn"],
      packed["w_fc"], packed["b_fc"])

    # .unsqueeze(0).unsqueeze(-1).unsqueeze(-1)
    return summary[None, :, :, None, None]


def _reference(x, params):
    """Pure-JAX reference of the PyTorch forward for validation."""
    if x.ndim == 4 and x.shape[2] == 1:
        x = jnp.squeeze(x, axis=2)
    N, T, D_in = x.shape
    H = params["w_hr"].shape[0]
    h = jnp.zeros((N, H), jnp.float32)
    for t in range(T):
        xt = x[:, t, :]
        r = jax.nn.sigmoid(xt @ params["w_ir"].T + params["b_ir"]
                           + h @ params["w_hr"].T + params["b_hr"])
        z = jax.nn.sigmoid(xt @ params["w_iz"].T + params["b_iz"]
                           + h @ params["w_hz"].T + params["b_hz"])
        n = jnp.tanh(xt @ params["w_in"].T + params["b_in"]
                     + r * (h @ params["w_hn"].T + params["b_hn"]))
        h = (1.0 - z) * n + z * h
    summary = h @ params["w_fc"].T + params["b_fc"]
    return summary[None, :, :, None, None]


if __name__ == "__main__":
    # Small shapes consistent with the module's forward:
    # N future frames, seq_len T, input_dim D_in; hidden_dim H; output_dim O.
    N, T, D_in, H, O = 2, 8, 32, 32, 16

    key = jax.random.PRNGKey(0)
    k_x, k_p = jax.random.split(key)

    # Exercise the [N, T, 1, D_in] path (gets squeezed, like the PyTorch code).
    x = jax.random.normal(k_x, (N, T, 1, D_in), dtype=jnp.float32)
    params = init_params(k_p, D_in, H, O)
    packed = pack_params(params)          # one-time weight packing (not per call)

    ref = jax.block_until_ready(_reference(x, params))

    # Multi-chunk path (grid of 2 sequential steps, h carried in VMEM scratch).
    out_chunked = jax.block_until_ready(
        temporal_feature_aggregator(x, packed, time_chunk=4))
    # Default heuristic path (single chunk for this tiny T).
    out_default = jax.block_until_ready(
        temporal_feature_aggregator(x, packed))

    for out in (out_chunked, out_default):
        assert out.shape == (1, N, O, 1, 1), out.shape
        assert np.allclose(np.asarray(out), np.asarray(ref),
                           atol=1e-5, rtol=1e-5)

    print("KERNEL_OK")
</pallas_src>

<mosaic_0001>
module attributes {stable_mosaic.version = 11 : i64} {
  func.func @_gru_agg_kernel(%arg0: i32, %arg1: memref<8x32xf32, #tpu.memory_space<vmem>>, %arg2: memref<32x96xf32, #tpu.memory_space<vmem>>, %arg3: memref<32x96xf32, #tpu.memory_space<vmem>>, %arg4: memref<1x96xf32, #tpu.memory_space<vmem>>, %arg5: memref<1x32xf32, #tpu.memory_space<vmem>>, %arg6: memref<32x16xf32, #tpu.memory_space<vmem>>, %arg7: memref<1x16xf32, #tpu.memory_space<vmem>>, %arg8: memref<2x16xf32, #tpu.memory_space<vmem>>, %arg9: memref<2x32xf32, #tpu.memory_space<vmem>>) attributes {dimension_semantics = [#tpu.dimension_semantics<arbitrary>], iteration_bounds = array<i64: 2>, scalar_prefetch = 0 : i64, scratch_operands = 1 : i64, tpu.core_type = #tpu.core_type<tc>, window_params = [{transform_indices = @transform_0, window_bounds = array<i64: 8, 32>}, {pipeline_mode = #tpu.pipeline_mode<synchronous>, transform_indices = @transform_1, window_bounds = array<i64: 32, 96>}, {pipeline_mode = #tpu.pipeline_mode<synchronous>, transform_indices = @transform_2, window_bounds = array<i64: 32, 96>}, {pipeline_mode = #tpu.pipeline_mode<synchronous>, transform_indices = @transform_3, window_bounds = array<i64: 1, 96>}, {pipeline_mode = #tpu.pipeline_mode<synchronous>, transform_indices = @transform_4, window_bounds = array<i64: 1, 32>}, {pipeline_mode = #tpu.pipeline_mode<synchronous>, transform_indices = @transform_5, window_bounds = array<i64: 32, 16>}, {pipeline_mode = #tpu.pipeline_mode<synchronous>, transform_indices = @transform_6, window_bounds = array<i64: 1, 16>}, {pipeline_mode = #tpu.pipeline_mode<synchronous>, transform_indices = @transform_7, window_bounds = array<i64: 2, 16>}]} {
    %c0_i32 = arith.constant 0 : i32
    %0 = arith.cmpi eq, %arg0, %c0_i32 : i32
    %1 = arith.extui %0 : i1 to i32
    %c0_i32_0 = arith.constant 0 : i32
    %2 = arith.cmpi ne, %1, %c0_i32_0 : i32
    scf.if %2 {
      %cst_31 = arith.constant 0.000000e+00 : f32
      %136 = vector.broadcast %cst_31 : f32 to vector<2x32xf32>
      %c0_32 = arith.constant 0 : index
      %c0_33 = arith.constant 0 : index
      %137 = vector.load %arg9[%c0_32, %c0_33] : memref<2x32xf32, #tpu.memory_space<vmem>>, vector<2x32xf32>
      tpu.vector_store %arg9[%c0_32, %c0_33], %136 {strides = array<i32>} : memref<2x32xf32, #tpu.memory_space<vmem>>, vector<2x32xf32>,
    } else {
    }
    %c0 = arith.constant 0 : index
    %c0_1 = arith.constant 0 : index
    %3 = vector.load %arg1[%c0, %c0_1] : memref<8x32xf32, #tpu.memory_space<vmem>>, vector<8x32xf32>
    %c0_2 = arith.constant 0 : index
    %c0_3 = arith.constant 0 : index
    %4 = vector.load %arg2[%c0_2, %c0_3] : memref<32x96xf32, #tpu.memory_space<vmem>>, vector<32x96xf32>
    %cst = arith.constant dense<0.000000e+00> : vector<8x96xf32>
    %5 = tpu.matmul %3, %4, %cst {dimension_numbers = #tpu.dot_dimension_numbers<[1], [0], [0], [1], [0, 0, 1, 1], [], []>} : vector<8x32xf32>, vector<32x96xf32>, vector<8x96xf32> -> vector<8x96xf32>
    %c0_4 = arith.constant 0 : index
    %c0_5 = arith.constant 0 : index
    %6 = vector.load %arg4[%c0_4, %c0_5] : memref<1x96xf32, #tpu.memory_space<vmem>>, vector<1x96xf32>
    %7 = vector.broadcast %6 : vector<1x96xf32> to vector<8x96xf32>
    %8 = arith.addf %5, %7 : vector<8x96xf32>
    %c0_6 = arith.constant 0 : index
    %c0_7 = arith.constant 0 : index
    %9 = vector.load %arg3[%c0_6, %c0_7] : memref<32x96xf32, #tpu.memory_space<vmem>>, vector<32x96xf32>
    %c0_8 = arith.constant 0 : index
    %c0_9 = arith.constant 0 : index
    %10 = vector.load %arg5[%c0_8, %c0_9] : memref<1x32xf32, #tpu.memory_space<vmem>>, vector<1x32xf32>
    %c0_10 = arith.constant 0 : index
    %c0_11 = arith.constant 0 : index
    %11 = vector.load %arg9[%c0_10, %c0_11] : memref<2x32xf32, #tpu.memory_space<vmem>>, vector<2x32xf32>
    %12 = vector.extract_strided_slice %8 {offsets = [0, 0], sizes = [2, 96], strides = [1, 1]} : vector<8x96xf32> to vector<2x96xf32>
    %cst_12 = arith.constant dense<0.000000e+00> : vector<2x96xf32>
    %13 = tpu.matmul %11, %9, %cst_12 {dimension_numbers = #tpu.dot_dimension_numbers<[1], [0], [0], [1], [0, 0, 1, 1], [], []>} : vector<2x32xf32>, vector<32x96xf32>, vector<2x96xf32> -> vector<2x96xf32>
    %14 = vector.extract_strided_slice %12 {offsets = [0, 0], sizes = [2, 32], strides = [1, 1]} : vector<2x96xf32> to vector<2x32xf32>
    %15 = vector.extract_strided_slice %13 {offsets = [0, 0], sizes = [2, 32], strides = [1, 1]} : vector<2x96xf32> to vector<2x32xf32>
    %16 = arith.addf %14, %15 : vector<2x32xf32>
    %17 = arith.negf %16 : vector<2x32xf32>
    %18 = math.exp %17 : vector<2x32xf32>
    %cst_13 = arith.constant 1.000000e+00 : f32
    %19 = vector.broadcast %cst_13 : f32 to vector<2x32xf32>
    %20 = arith.addf %19, %18 : vector<2x32xf32>
    %21 = arith.divf %19, %20 : vector<2x32xf32>
    %22 = vector.extract_strided_slice %12 {offsets = [0, 32], sizes = [2, 32], strides = [1, 1]} : vector<2x96xf32> to vector<2x32xf32>
    %23 = vector.extract_strided_slice %13 {offsets = [0, 32], sizes = [2, 32], strides = [1, 1]} : vector<2x96xf32> to vector<2x32xf32>
    %24 = arith.addf %22, %23 : vector<2x32xf32>
    %25 = arith.negf %24 : vector<2x32xf32>
    %26 = math.exp %25 : vector<2x32xf32>
    %cst_14 = arith.constant 1.000000e+00 : f32
    %27 = vector.broadcast %cst_14 : f32 to vector<2x32xf32>
    %28 = arith.addf %27, %26 : vector<2x32xf32>
    %29 = arith.divf %27, %28 : vector<2x32xf32>
    %30 = vector.extract_strided_slice %12 {offsets = [0, 64], sizes = [2, 32], strides = [1, 1]} : vector<2x96xf32> to vector<2x32xf32>
    %31 = vector.extract_strided_slice %13 {offsets = [0, 64], sizes = [2, 32], strides = [1, 1]} : vector<2x96xf32> to vector<2x32xf32>
    %32 = vector.broadcast %10 : vector<1x32xf32> to vector<2x32xf32>
    %33 = arith.addf %31, %32 : vector<2x32xf32>
    %34 = arith.mulf %21, %33 : vector<2x32xf32>
    %35 = arith.addf %30, %34 : vector<2x32xf32>
    %36 = math.tanh %35 : vector<2x32xf32>
    %cst_15 = arith.constant 1.000000e+00 : f32
    %37 = vector.broadcast %cst_15 : f32 to vector<2x32xf32>
    %38 = arith.subf %37, %29 : vector<2x32xf32>
    %39 = arith.mulf %38, %36 : vector<2x32xf32>
    %40 = arith.mulf %29, %11 : vector<2x32xf32>
    %41 = arith.addf %39, %40 : vector<2x32xf32>
    %42 = vector.extract_strided_slice %8 {offsets = [2, 0], sizes = [2, 96], strides = [1, 1]} : vector<8x96xf32> to vector<2x96xf32>
    %cst_16 = arith.constant dense<0.000000e+00> : vector<2x96xf32>
    %43 = tpu.matmul %41, %9, %cst_16 {dimension_numbers = #tpu.dot_dimension_numbers<[1], [0], [0], [1], [0, 0, 1, 1], [], []>} : vector<2x32xf32>, vector<32x96xf32>, vector<2x96xf32> -> vector<2x96xf32>
    %44 = vector.extract_strided_slice %42 {offsets = [0, 0], sizes = [2, 32], strides = [1, 1]} : vector<2x96xf32> to vector<2x32xf32>
    %45 = vector.extract_strided_slice %43 {offsets = [0, 0], sizes = [2, 32], strides = [1, 1]} : vector<2x96xf32> to vector<2x32xf32>
    %46 = arith.addf %44, %45 : vector<2x32xf32>
    %47 = arith.negf %46 : vector<2x32xf32>
    %48 = math.exp %47 : vector<2x32xf32>
    %cst_17 = arith.constant 1.000000e+00 : f32
    %49 = vector.broadcast %cst_17 : f32 to vector<2x32xf32>
    %50 = arith.addf %49, %48 : vector<2x32xf32>
    %51 = arith.divf %49, %50 : vector<2x32xf32>
    %52 = vector.extract_strided_slice %42 {offsets = [0, 32], sizes = [2, 32], strides = [1, 1]} : vector<2x96xf32> to vector<2x32xf32>
    %53 = vector.extract_strided_slice %43 {offsets = [0, 32], sizes = [2, 32], strides = [1, 1]} : vector<2x96xf32> to vector<2x32xf32>
    %54 = arith.addf %52, %53 : vector<2x32xf32>
    %55 = arith.negf %54 : vector<2x32xf32>
    %56 = math.exp %55 : vector<2x32xf32>
    %cst_18 = arith.constant 1.000000e+00 : f32
    %57 = vector.broadcast %cst_18 : f32 to vector<2x32xf32>
    %58 = arith.addf %57, %56 : vector<2x32xf32>
    %59 = arith.divf %57, %58 : vector<2x32xf32>
    %60 = vector.extract_strided_slice %42 {offsets = [0, 64], sizes = [2, 32], strides = [1, 1]} : vector<2x96xf32> to vector<2x32xf32>
    %61 = vector.extract_strided_slice %43 {offsets = [0, 64], sizes = [2, 32], strides = [1, 1]} : vector<2x96xf32> to vector<2x32xf32>
    %62 = vector.broadcast %10 : vector<1x32xf32> to vector<2x32xf32>
    %63 = arith.addf %61, %62 : vector<2x32xf32>
    %64 = arith.mulf %51, %63 : vector<2x32xf32>
    %65 = arith.addf %60, %64 : vector<2x32xf32>
    %66 = math.tanh %65 : vector<2x32xf32>
    %cst_19 = arith.constant 1.000000e+00 : f32
    %67 = vector.broadcast %cst_19 : f32 to vector<2x32xf32>
    %68 = arith.subf %67, %59 : vector<2x32xf32>
    %69 = arith.mulf %68, %66 : vector<2x32xf32>
    %70 = arith.mulf %59, %41 : vector<2x32xf32>
    %71 = arith.addf %69, %70 : vector<2x32xf32>
    %72 = vector.extract_strided_slice %8 {offsets = [4, 0], sizes = [2, 96], strides = [1, 1]} : vector<8x96xf32> to vector<2x96xf32>
    %cst_20 = arith.constant dense<0.000000e+00> : vector<2x96xf32>
    %73 = tpu.matmul %71, %9, %cst_20 {dimension_numbers = #tpu.dot_dimension_numbers<[1], [0], [0], [1], [0, 0, 1, 1], [], []>} : vector<2x32xf32>, vector<32x96xf32>, vector<2x96xf32> -> vector<2x96xf32>
    %74 = vector.extract_strided_slice %72 {offsets = [0, 0], sizes = [2, 32], strides = [1, 1]} : vector<2x96xf32> to vector<2x32xf32>
    %75 = vector.extract_strided_slice %73 {offsets = [0, 0], sizes = [2, 32], strides = [1, 1]} : vector<2x96xf32> to vector<2x32xf32>
    %76 = arith.addf %74, %75 : vector<2x32xf32>
    %77 = arith.negf %76 : vector<2x32xf32>
    %78 = math.exp %77 : vector<2x32xf32>
    %cst_21 = arith.constant 1.000000e+00 : f32
    %79 = vector.broadcast %cst_21 : f32 to vector<2x32xf32>
    %80 = arith.addf %79, %78 : vector<2x32xf32>
    %81 = arith.divf %79, %80 : vector<2x32xf32>
    %82 = vector.extract_strided_slice %72 {offsets = [0, 32], sizes = [2, 32], strides = [1, 1]} : vector<2x96xf32> to vector<2x32xf32>
    %83 = vector.extract_strided_slice %73 {offsets = [0, 32], sizes = [2, 32], strides = [1, 1]} : vector<2x96xf32> to vector<2x32xf32>
    %84 = arith.addf %82, %83 : vector<2x32xf32>
    %85 = arith.negf %84 : vector<2x32xf32>
    %86 = math.exp %85 : vector<2x32xf32>
    %cst_22 = arith.constant 1.000000e+00 : f32
    %87 = vector.broadcast %cst_22 : f32 to vector<2x32xf32>
    %88 = arith.addf %87, %86 : vector<2x32xf32>
    %89 = arith.divf %87, %88 : vector<2x32xf32>
    %90 = vector.extract_strided_slice %72 {offsets = [0, 64], sizes = [2, 32], strides = [1, 1]} : vector<2x96xf32> to vector<2x32xf32>
    %91 = vector.extract_strided_slice %73 {offsets = [0, 64], sizes = [2, 32], strides = [1, 1]} : vector<2x96xf32> to vector<2x32xf32>
    %92 = vector.broadcast %10 : vector<1x32xf32> to vector<2x32xf32>
    %93 = arith.addf %91, %92 : vector<2x32xf32>
    %94 = arith.mulf %81, %93 : vector<2x32xf32>
    %95 = arith.addf %90, %94 : vector<2x32xf32>
    %96 = math.tanh %95 : vector<2x32xf32>
    %cst_23 = arith.constant 1.000000e+00 : f32
    %97 = vector.broadcast %cst_23 : f32 to vector<2x32xf32>
    %98 = arith.subf %97, %89 : vector<2x32xf32>
    %99 = arith.mulf %98, %96 : vector<2x32xf32>
    %100 = arith.mulf %89, %71 : vector<2x32xf32>
    %101 = arith.addf %99, %100 : vector<2x32xf32>
    %102 = vector.extract_strided_slice %8 {offsets = [6, 0], sizes = [2, 96], strides = [1, 1]} : vector<8x96xf32> to vector<2x96xf32>
    %cst_24 = arith.constant dense<0.000000e+00> : vector<2x96xf32>
    %103 = tpu.matmul %101, %9, %cst_24 {dimension_numbers = #tpu.dot_dimension_numbers<[1], [0], [0], [1], [0, 0, 1, 1], [], []>} : vector<2x32xf32>, vector<32x96xf32>, vector<2x96xf32> -> vector<2x96xf32>
    %104 = vector.extract_strided_slice %102 {offsets = [0, 0], sizes = [2, 32], strides = [1, 1]} : vector<2x96xf32> to vector<2x32xf32>
    %105 = vector.extract_strided_slice %103 {offsets = [0, 0], sizes = [2, 32], strides = [1, 1]} : vector<2x96xf32> to vector<2x32xf32>
    %106 = arith.addf %104, %105 : vector<2x32xf32>
    %107 = arith.negf %106 : vector<2x32xf32>
    %108 = math.exp %107 : vector<2x32xf32>
    %cst_25 = arith.constant 1.000000e+00 : f32
    %109 = vector.broadcast %cst_25 : f32 to vector<2x32xf32>
    %110 = arith.addf %109, %108 : vector<2x32xf32>
    %111 = arith.divf %109, %110 : vector<2x32xf32>
    %112 = vector.extract_strided_slice %102 {offsets = [0, 32], sizes = [2, 32], strides = [1, 1]} : vector<2x96xf32> to vector<2x32xf32>
    %113 = vector.extract_strided_slice %103 {offsets = [0, 32], sizes = [2, 32], strides = [1, 1]} : vector<2x96xf32> to vector<2x32xf32>
    %114 = arith.addf %112, %113 : vector<2x32xf32>
    %115 = arith.negf %114 : vector<2x32xf32>
    %116 = math.exp %115 : vector<2x32xf32>
    %cst_26 = arith.constant 1.000000e+00 : f32
    %117 = vector.broadcast %cst_26 : f32 to vector<2x32xf32>
    %118 = arith.addf %117, %116 : vector<2x32xf32>
    %119 = arith.divf %117, %118 : vector<2x32xf32>
    %120 = vector.extract_strided_slice %102 {offsets = [0, 64], sizes = [2, 32], strides = [1, 1]} : vector<2x96xf32> to vector<2x32xf32>
    %121 = vector.extract_strided_slice %103 {offsets = [0, 64], sizes = [2, 32], strides = [1, 1]} : vector<2x96xf32> to vector<2x32xf32>
    %122 = vector.broadcast %10 : vector<1x32xf32> to vector<2x32xf32>
    %123 = arith.addf %121, %122 : vector<2x32xf32>
    %124 = arith.mulf %111, %123 : vector<2x32xf32>
    %125 = arith.addf %120, %124 : vector<2x32xf32>
    %126 = math.tanh %125 : vector<2x32xf32>
    %cst_27 = arith.constant 1.000000e+00 : f32
    %127 = vector.broadcast %cst_27 : f32 to vector<2x32xf32>
    %128 = arith.subf %127, %119 : vector<2x32xf32>
    %129 = arith.mulf %128, %126 : vector<2x32xf32>
    %130 = arith.mulf %119, %101 : vector<2x32xf32>
    %131 = arith.addf %129, %130 : vector<2x32xf32>
    %c0_28 = arith.constant 0 : index
    %c0_29 = arith.constant 0 : index
    %132 = vector.load %arg9[%c0_28, %c0_29] : memref<2x32xf32, #tpu.memory_space<vmem>>, vector<2x32xf32>
    tpu.vector_store %arg9[%c0_28, %c0_29], %131 {strides = array<i32>} : memref<2x32xf32, #tpu.memory_space<vmem>>, vector<2x32xf32>,
    %c1_i32 = arith.constant 1 : i32
    %133 = arith.cmpi eq, %arg0, %c1_i32 : i32
    %134 = arith.extui %133 : i1 to i32
    %c0_i32_30 = arith.constant 0 : i32
    %135 = arith.cmpi ne, %134, %c0_i32_30 : i32
    scf.if %135 {
      %c0_31 = arith.constant 0 : index
      %c0_32 = arith.constant 0 : index
      %136 = vector.load %arg6[%c0_31, %c0_32] : memref<32x16xf32, #tpu.memory_space<vmem>>, vector<32x16xf32>
      %cst_33 = arith.constant dense<0.000000e+00> : vector<2x16xf32>
      %137 = tpu.matmul %131, %136, %cst_33 {dimension_numbers = #tpu.dot_dimension_numbers<[1], [0], [0], [1], [0, 0, 1, 1], [], []>} : vector<2x32xf32>, vector<32x16xf32>, vector<2x16xf32> -> vector<2x16xf32>
      %c0_34 = arith.constant 0 : index
      %c0_35 = arith.constant 0 : index
      %138 = vector.load %arg7[%c0_34, %c0_35] : memref<1x16xf32, #tpu.memory_space<vmem>>, vector<1x16xf32>
      %139 = vector.broadcast %138 : vector<1x16xf32> to vector<2x16xf32>
      %140 = arith.addf %137, %139 : vector<2x16xf32>
      %c0_36 = arith.constant 0 : index
      %c0_37 = arith.constant 0 : index
      %141 = vector.load %arg8[%c0_36, %c0_37] : memref<2x16xf32, #tpu.memory_space<vmem>>, vector<2x16xf32>
      tpu.vector_store %arg8[%c0_36, %c0_37], %140 {strides = array<i32>} : memref<2x16xf32, #tpu.memory_space<vmem>>, vector<2x16xf32>,
    } else {
    }
    return
  }
  func.func @transform_0(%arg0: i32) -> (i32, i32) {
    %c0_i32 = arith.constant 0 : i32
    %c0_i32_0 = arith.constant 0 : i32
    return %arg0, %c0_i32 : i32, i32
  }
  func.func @transform_1(%arg0: i32) -> (i32, i32) {
    %c0_i32 = arith.constant 0 : i32
    %c0_i32_0 = arith.constant 0 : i32
    %c0_i32_1 = arith.constant 0 : i32
    return %c0_i32, %c0_i32_0 : i32, i32
  }
  func.func @transform_2(%arg0: i32) -> (i32, i32) {
    %c0_i32 = arith.constant 0 : i32
    %c0_i32_0 = arith.constant 0 : i32
    %c0_i32_1 = arith.constant 0 : i32
    return %c0_i32, %c0_i32_0 : i32, i32
  }
  func.func @transform_3(%arg0: i32) -> (i32, i32) {
    %c0_i32 = arith.constant 0 : i32
    %c0_i32_0 = arith.constant 0 : i32
    %c0_i32_1 = arith.constant 0 : i32
    return %c0_i32, %c0_i32_0 : i32, i32
  }
  func.func @transform_4(%arg0: i32) -> (i32, i32) {
    %c0_i32 = arith.constant 0 : i32
    %c0_i32_0 = arith.constant 0 : i32
    %c0_i32_1 = arith.constant 0 : i32
    return %c0_i32, %c0_i32_0 : i32, i32
  }
  func.func @transform_5(%arg0: i32) -> (i32, i32) {
    %c0_i32 = arith.constant 0 : i32
    %c0_i32_0 = arith.constant 0 : i32
    %c0_i32_1 = arith.constant 0 : i32
    return %c0_i32, %c0_i32_0 : i32, i32
  }
  func.func @transform_6(%arg0: i32) -> (i32, i32) {
    %c0_i32 = arith.constant 0 : i32
    %c0_i32_0 = arith.constant 0 : i32
    %c0_i32_1 = arith.constant 0 : i32
    return %c0_i32, %c0_i32_0 : i32, i32
  }
  func.func @transform_7(%arg0: i32) -> (i32, i32) {
    %c0_i32 = arith.constant 0 : i32
    %c0_i32_0 = arith.constant 0 : i32
    %c0_i32_1 = arith.constant 0 : i32
    return %c0_i32, %c0_i32_0 : i32, i32
  }
}

</mosaic_0001>

<bundles_post_ra>
// kernel: tpu_custom_call.1
= control target key start
LH: loop header
LB: loop body
LE: loop exit
PB: predicated region body
PF: predicated region fallthrough
CT: control target
= control target key end

     0   :  { %12 = vsyncpa [#allocation4], 0  ;;  %s1023_s0 = inlined_call_operand.vmem [shape: f32[16,32], index: 0, kind: input, shape index: {}]   ;;  %s1024_s1 = inlined_call_operand.vmem [shape: f32[32,96], index: 1, kind: input, shape index: {}]   ;;  %s1025_s2 = inlined_call_operand.hbm [shape: f32[32,96], index: 2, kind: input, shape index: {}]   ;;  %s1026_s3 = inlined_call_operand.vmem [shape: f32[1,96], index: 3, kind: input, shape index: {}]   ;;  %s1027_s4 = inlined_call_operand.vmem [shape: f32[1,32], index: 4, kind: input, shape index: {}]   ;;  %s1028_s5 = inlined_call_operand.vmem [shape: f32[32,16], index: 5, kind: input, shape index: {}]   ;;  %s1029_s6 = inlined_call_operand.vmem [shape: f32[1,16], index: 6, kind: input, shape index: {}]   ;;  %s1030_s7 = inlined_call_operand.hbm [shape: f32[2,16], index: 7, kind: output, shape index: {}]  }
   0x1   :  { %13 = vsyncpa [#allocation5], 0  ;;  %s921_s24 = smov 0  }
   0x2 LB: > { %s211_s27 = sshll.u32 %s1025_s2, 4  ;;  %s930_s28 = sadd.s32 4294967295, %s870_s24   ;;  %s870_s24 = sphi %s921_s24, %s19_s24   ;;  %s212_s27 = int_to_ptr.hbm [resolvable:$true] %s211_s27 }
   0x3   : > { %p716_p0 = scmp.ge.s32.totalorder %s870_s24, 1  ;;  %p197_p1 = scmp.lt.s32.totalorder %s870_s24, 3 }
   0x4   : > { %p717_p2 = scmp.ne.s32.totalorder %s930_s28, 0  ;;  %p750_p3 = scmp.eq.s32.totalorder %s930_s28, 0 }
   0x5   : > { %p198_p4 = pnand %p716_p0, %p197_p1  ;;  %s872_s29 = smov [#allocation3]  }
   0x6   : > { %s213_s30 = sshll.u32 %s872_s29, 4  ;;  %s873_s8 = smov 128   ;;  %s214_s30 = int_to_ptr.vmem [resolvable:$true] %s213_s30 }
   0x7   : > { %p746_p5 = pneg %p198_p4  ;;  %s874_s9 = smov 8  }
   0x8   : > { %248 = sbr.rel (%p198_p4) target bundleno = 2597 (0xa25), region = 48 }
   0x9   : > { %p747_p6 = pnand %p750_p3, %p746_p5 }
   0xb   : > { %749 = dma.hbm_to_vmem [thread:$0]  (!%p747_p6), %s212_s27, 512, %s214_s30, [#allocation4], %s873_s8, %s873_s8, %s874_s9  }
   0xd   : > { %861 = dma.done.wait (%p750_p3), [#allocation4], 512  }
   0xe   : > { %863 = vsyncadd (%p750_p3), [#allocation4], 4294966784  ;;  %p275_p7 = scmp.lt.s32.totalorder %s930_s28, 1 }
   0xf   : > { %282 = sbr.rel (%p717_p2) target bundleno = 22 (0x16), region = 56 }
  0x10   : > { %s276_s10 = scalar_select %p275_p7, %s930_s28, 1 }
  0x12   : > { %s721_s11 = sshll.u32 %s276_s10, 3 }
  0x13   : > { %s278_s14 = scalar_lea.vmem %s1023_s0, %s721_s11 }
  0x14   : > { %vm283_vm0 = vcmask 254976   ;;  %v875_v0 = vmov 0.0  }
  0x15   : > { %284 = vst.msk [vmem:[#allocation2] sm:$0x3] %vm283_vm0, %v875_v0 }
  0x16 PF: > { %v289_v1 = vld [vmem:[%s1024_s1 + $0x18] sm:$0xff]  ;;  %v288_v3 = vld [vmem:[%s1024_s1 + $0x10] sm:$0xff]  ;;  %v287_v5 = vld [vmem:[%s1024_s1 + $0x8] sm:$0xff]  ;;  %s876_s26 = smov 32   ;;  %vm294_vm1 = vcmask 261120   ;;  %s877_s27 = smov 64  }
  0x17   : > { %v321_v2 = vld [vmem:[#allocation3 + $0x18] sm:$0xff]  ;;  %310 = vmatpush.msra.mxu0 %v289_v1  ;;  %v320_v4 = vld [vmem:[#allocation3 + $0x10] sm:$0xff]  ;;  %v319_v6 = vld [vmem:[#allocation3 + $0x8] sm:$0xff]  ;;  %s878_s8 = smov 96   ;;  %p732_p8 = scmp.ne.s32.totalorder %s930_s28, 1 }
  0x18   : > { %339 = vmatpush.msra.mxu1 %v321_v2  ;;  %412 = vmatpush.msra.mxu2 %v321_v2  ;;  %v771_v8 = vld [vmem:[%s1027_s4] ss:$0 sm:$0xff]  ;;  %v318_v10 = vld [vmem:[#allocation3] sm:$0xff]  ;;  %s879_s13 = smov (!%p732_p8), 96  }
  0x19   : > { %484 = vmatpush.msra.mxu3 %v321_v2  ;;  %311 = vmatpush.msra.mxu0 %v288_v3  ;;  %v286_v9 = vld [vmem:[%s1024_s1] sm:$0xff] }
  0x1a   : > { %340 = vmatpush.msra.mxu1 %v320_v4  ;;  %413 = vmatpush.msra.mxu2 %v320_v4  ;;  %v285_v11 = vld [vmem:[%s278_s14] sm:$0xff] }
  0x1b   : > { %312 = vmatpush.msra.mxu0 %v287_v5  ;;  %369 = vrot.lane.b32.xlu0 %v771_v8, %s877_s27  ;;  %v772_v15 = vld [vmem:[%s1026_s3] ss:$0 sm:$0xff] }
  0x1c   : > { %v323_v7 = vld [vmem:[#allocation2] sm:$0x3]  ;;  %341 = vmatpush.msra.mxu1 %v319_v6  ;;  %414 = vmatpush.msra.mxu2 %v319_v6 }
  0x1d   : > { %390 = vrot.lane.b32.xlu2 %v323_v7, %s876_s26  ;;  %313 = vmatpush.msra.mxu0 %v286_v9 }
  0x1e   : > { %342 = vmatpush.msra.mxu1 %v318_v10  ;;  %723 = vmatmul.msk.f32.vlgmr.msra.gmra.mxu0 %vm294_vm1, %v285_v11 }
  0x1f   : > { %724 = vmatmul.msk.f32.vlgmr.msra.gmra.mxu1 %vm294_vm1, %v323_v7  ;;  %415 = vmatpush.msra.mxu2 %v318_v10 }
  0x20   : > { %485 = vmatpush.msra.mxu3 %v320_v4  ;;  %556 = vmatpush.msrb.mxu0 %v321_v2 }
  0x22   : > { %486 = vmatpush.msra.mxu3 %v319_v6  ;;  %557 = vmatpush.msrb.mxu0 %v320_v4 }
  0x24   : > { %487 = vmatpush.msra.mxu3 %v318_v10  ;;  %558 = vmatpush.msrb.mxu0 %v319_v6 }
  0x26   : > { %559 = vmatpush.msrb.mxu0 %v318_v10 }
  0x77   : > { %v391_v37 = vpop.permute.xlu2 %390 }
  0x8d   : > { %v961_v12 = vpop.permute.xlu0 %369 }
  0x9b   : > { %v315_v16 = vpop.f32.mrf.mxu0 }
  0x9c   : > { %v344_v13 = vpop.f32.mrf.mxu1  ;;  %v968_v17 = vadd.f32 %v772_v15, %v315_v16 }
  0x9d   : > { %v372_v14 = vadd.f32 %v961_v12, %v344_v13 }
  0x9e   : > { %v347_v18 = vadd.f32 %v344_v13, %v968_v17 }
  0x9f   : > { %374 = vrot.lane.b32.xlu0 %v372_v14, %s877_s27 }
  0xa0   : > { %v725_v19 = vmul.f32 -1.442695, %v347_v18 }
  0xa2   : > { %773 = vpow2.f32 %v725_v19 }
  0xa8   : > { %v774_v20 = vpop.eup %773 }
  0xa9   : > { %v351_v21 = vadd.f32 1.0, %v774_v20 }
  0xab   : > { %775 = vrcp.f32 %v351_v21  ;;  %v363_v27 = vand.u32 2147483648, %v351_v21  ;;  %vm357_vm3 = vweird.f32 %v351_v21  ;;  %v361_v28 = vand.u32 2147483647, %v351_v21 }
  0xad   : > { %v364_v30 = vor.u32 1.1754944e-38, %v363_v27  ;;  %vm362_vm5 = vcmp.eq.f32.partialorder %v361_v28, 8.507059e+37 }
  0xb1   : > { %v776_v22 = vpop.eup %775 }
  0xb2   : > { %v353_v23 = vmul.f32 %v776_v22, %v351_v21  ;;  %vm358_vm2 = vweird.f32 %v776_v22 }
  0xb3   : > { %vm359_vm4 = vmor %vm357_vm3, %vm358_vm2  ;;  %vm614_vm3 = vcmask 261126  }
  0xb4   : > { %v354_v24 = vsub.f32 1.0, %v353_v23 }
  0xb6   : > { %v355_v25 = vmul.f32 %v776_v22, %v354_v24 }
  0xb8   : > { %v356_v26 = vadd.f32 %v776_v22, %v355_v25 }
  0xba   : > { %v360_v29 = vsel %vm359_vm4, %v776_v22, %v356_v26 }
  0xbb   : > { %v365_v31 = vsel %vm362_vm5, %v364_v30, %v360_v29 }
  0xbc   : > { %v384_v38 = vsub.f32 1.0, %v365_v31  ;;  %v393_v40 = vmul.f32 %v391_v37, %v365_v31 }
 0x111   : > { %v375_v32 = vpop.permute.xlu0 %374 }
 0x112   : > { %v377_v33 = vmul.f32 %v375_v32, %v365_v31 }
 0x114   : > { %379 = vrot.lane.b32.xlu1 %v377_v33, %s877_s27 }
 0x186   : > { %v380_v34 = vpop.permute.xlu1 %379 }
 0x187   : > { %v382_v35 = vadd.f32 %v380_v34, %v968_v17 }
 0x189   : > { %777 = vtanh.f32 %v382_v35 }
 0x18f   : > { %v778_v36 = vpop.eup %777 }
 0x190   : > { %386 = vrot.lane.b32.xlu1 %v778_v36, %s878_s8 }
 0x202   : > { %v387_v39 = vpop.permute.xlu1 %386 }
 0x203   : > { %v389_v41 = vmul.f32 %v387_v39, %v384_v38 }
 0x205   : > { %v394_v42 = vadd.f32 %v393_v40, %v389_v41 }
 0x207   : > { %396 = vrot.lane.b32.xlu2 %v394_v42, %s878_s8  ;;  %v462_v3 = vrot.slane %v394_v42, 6 }
 0x261   : > { %v397_v43 = vpop.permute.xlu2 %396 }
 0x262   : > { %726 = vmatmul.msk.f32.vlgmr.msra.gmra.mxu2 %vm294_vm1, %v397_v43 }
 0x2e5   : > { %v417_v44 = vpop.f32.mrf.mxu2 }
 0x2e6   : > { %v443_v45 = vadd.f32 %v417_v44, %v961_v12  ;;  %v421_v47 = vrot.slane %v417_v44, 6 }
 0x2e8   : > { %v445_v46 = vrot.slane %v443_v45, 6  ;;  %v423_v48 = vadd.f32 %v421_v47, %v968_v17 }
 0x2ea   : > { %446 = vrot.lane.b32.xlu0 %v445_v46, %s877_s27  ;;  %v727_v49 = vmul.f32 -1.442695, %v423_v48 }
 0x2ec   : > { %779 = vpow2.f32 %v727_v49 }
 0x2f2   : > { %v780_v50 = vpop.eup %779 }
 0x2f3   : > { %v427_v51 = vadd.f32 1.0, %v780_v50 }
 0x2f5   : > { %781 = vrcp.f32 %v427_v51  ;;  %v439_v57 = vand.u32 2147483648, %v427_v51  ;;  %vm433_vm7 = vweird.f32 %v427_v51  ;;  %v437_v58 = vand.u32 2147483647, %v427_v51 }
 0x2f7   : > { %v440_v60 = vor.u32 1.1754944e-38, %v439_v57  ;;  %vm438_vm9 = vcmp.eq.f32.partialorder %v437_v58, 8.507059e+37 }
 0x2fb   : > { %v782_v52 = vpop.eup %781 }
 0x2fc   : > { %v429_v53 = vmul.f32 %v782_v52, %v427_v51  ;;  %vm434_vm6 = vweird.f32 %v782_v52 }
 0x2fd   : > { %vm435_vm8 = vmor %vm433_vm7, %vm434_vm6 }
 0x2fe   : > { %v430_v54 = vsub.f32 1.0, %v429_v53 }
 0x300   : > { %v431_v55 = vmul.f32 %v782_v52, %v430_v54 }
 0x302   : > { %v432_v56 = vadd.f32 %v782_v52, %v431_v55 }
 0x304   : > { %v436_v59 = vsel %vm435_vm8, %v782_v52, %v432_v56 }
 0x305   : > { %v441_v62 = vsel %vm438_vm9, %v440_v60, %v436_v59 }
 0x306   : > { %v456_v4 = vsub.f32 1.0, %v441_v62  ;;  %v464_v7 = vmul.f32 %v462_v3, %v441_v62 }
 0x35c   : > { %v447_v61 = vpop.permute.xlu0 %446 }
 0x35d   : > { %v449_v63 = vmul.f32 %v447_v61, %v441_v62 }
 0x35f   : > { %451 = vrot.lane.b32.xlu1 %v449_v63, %s877_s27 }
 0x3d1   : > { %v452_v0 = vpop.permute.xlu1 %451 }
 0x3d2   : > { %v454_v1 = vadd.f32 %v452_v0, %v968_v17 }
 0x3d4   : > { %783 = vtanh.f32 %v454_v1 }
 0x3da   : > { %v784_v2 = vpop.eup %783 }
 0x3db   : > { %458 = vrot.lane.b32.xlu2 %v784_v2, %s878_s8 }
 0x435   : > { %v459_v5 = vpop.permute.xlu2 %458 }
 0x436   : > { %v461_v6 = vmul.f32 %v459_v5, %v456_v4 }
 0x438   : > { %v465_v8 = vadd.f32 %v464_v7, %v461_v6 }
 0x43a   : > { %v467_v9 = vrot.slane %v465_v8, 2  ;;  %v534_v36 = vrot.slane %v465_v8, 6 }
 0x43c   : > { %468 = vrot.lane.b32.xlu0 %v467_v9, %s878_s8 }
 0x4ae   : > { %v469_v10 = vpop.permute.xlu0 %468 }
 0x4af   : > { %728 = vmatmul.msk.f32.vlgmr.msra.gmra.mxu3 %vm294_vm1, %v469_v10 }
 0x532   : > { %v489_v11 = vpop.f32.mrf.mxu3 }
 0x533   : > { %v515_v13 = vadd.f32 %v489_v11, %v961_v12  ;;  %v493_v15 = vrot.slane %v489_v11, 4 }
 0x535   : > { %v517_v14 = vrot.slane %v515_v13, 4  ;;  %v495_v16 = vadd.f32 %v493_v15, %v968_v17 }
 0x537   : > { %518 = vrot.lane.b32.xlu1 %v517_v14, %s877_s27  ;;  %v729_v18 = vmul.f32 -1.442695, %v495_v16 }
 0x539   : > { %785 = vpow2.f32 %v729_v18 }
 0x53f   : > { %v786_v19 = vpop.eup %785 }
 0x540   : > { %v499_v20 = vadd.f32 1.0, %v786_v19 }
 0x542   : > { %787 = vrcp.f32 %v499_v20  ;;  %v511_v26 = vand.u32 2147483648, %v499_v20  ;;  %vm505_vm11 = vweird.f32 %v499_v20  ;;  %v509_v27 = vand.u32 2147483647, %v499_v20 }
 0x544   : > { %v512_v29 = vor.u32 1.1754944e-38, %v511_v26  ;;  %vm510_vm13 = vcmp.eq.f32.partialorder %v509_v27, 8.507059e+37 }
 0x548   : > { %v788_v21 = vpop.eup %787 }
 0x549   : > { %v501_v22 = vmul.f32 %v788_v21, %v499_v20  ;;  %vm506_vm10 = vweird.f32 %v788_v21 }
 0x54a   : > { %vm507_vm12 = vmor %vm505_vm11, %vm506_vm10 }
 0x54b   : > { %v502_v23 = vsub.f32 1.0, %v501_v22 }
 0x54d   : > { %v503_v24 = vmul.f32 %v788_v21, %v502_v23 }
 0x54f   : > { %v504_v25 = vadd.f32 %v788_v21, %v503_v24 }
 0x551   : > { %v508_v28 = vsel %vm507_vm12, %v788_v21, %v504_v25 }
 0x552   : > { %v513_v31 = vsel %vm510_vm13, %v512_v29, %v508_v28 }
 0x553   : > { %v528_v37 = vsub.f32 1.0, %v513_v31  ;;  %v536_v39 = vmul.f32 %v534_v36, %v513_v31 }
 0x5a9   : > { %v519_v30 = vpop.permute.xlu1 %518 }
 0x5aa   : > { %v521_v32 = vmul.f32 %v519_v30, %v513_v31 }
 0x5ac   : > { %523 = vrot.lane.b32.xlu2 %v521_v32, %s877_s27 }
 0x606   : > { %v524_v33 = vpop.permute.xlu2 %523 }
 0x607   : > { %v526_v34 = vadd.f32 %v524_v33, %v968_v17 }
 0x609   : > { %789 = vtanh.f32 %v526_v34 }
 0x60f   : > { %v790_v35 = vpop.eup %789 }
 0x610   : > { %530 = vrot.lane.b32.xlu0 %v790_v35, %s878_s8 }
 0x682   : > { %v531_v38 = vpop.permute.xlu0 %530 }
 0x683   : > { %v533_v40 = vmul.f32 %v531_v38, %v528_v37 }
 0x685   : > { %v537_v41 = vadd.f32 %v536_v39, %v533_v40 }
 0x687   : > { %v539_v42 = vrot.slane %v537_v41, 4  ;;  %v606_v59 = vrot.slane %v537_v41, 6 }
 0x689   : > { %540 = vrot.lane.b32.xlu1 %v539_v42, %s878_s8 }
 0x6fb   : > { %v541_v43 = vpop.permute.xlu1 %540 }
 0x6fc   : > { %730 = vmatmul.msk.f32.vlgmr.msrb.gmra.mxu0 %vm294_vm1, %v541_v43 }
 0x779   : > { %v561_v44 = vpop.f32.mrf.mxu0 }
 0x77a   : > { %v565_v45 = vrot.slane %v561_v44, 2  ;;  %v587_v46 = vadd.f32 %v561_v44, %v961_v12 }
 0x77c   : > { %v567_v47 = vadd.f32 %v565_v45, %v968_v17  ;;  %v589_v48 = vrot.slane %v587_v46, 2 }
 0x77e   : > { %v731_v49 = vmul.f32 -1.442695, %v567_v47  ;;  %590 = vrot.lane.b32.xlu2 %v589_v48, %s877_s27 }
 0x780   : > { %791 = vpow2.f32 %v731_v49 }
 0x786   : > { %v792_v50 = vpop.eup %791 }
 0x787   : > { %v571_v51 = vadd.f32 1.0, %v792_v50 }
 0x789   : > { %793 = vrcp.f32 %v571_v51  ;;  %v583_v55 = vand.u32 2147483648, %v571_v51  ;;  %v581_v57 = vand.u32 2147483647, %v571_v51  ;;  %vm577_vm15 = vweird.f32 %v571_v51 }
 0x78b   : > { %v584_v12 = vor.u32 1.1754944e-38, %v583_v55  ;;  %vm582_vm2 = vcmp.eq.f32.partialorder %v581_v57, 8.507059e+37 }
 0x78f   : > { %v794_v52 = vpop.eup %793 }
 0x790   : > { %v573_v53 = vmul.f32 %v794_v52, %v571_v51  ;;  %vm578_vm14 = vweird.f32 %v794_v52 }
 0x791   : > { %vm579_vm0 = vmor %vm577_vm15, %vm578_vm14 }
 0x792   : > { %v574_v54 = vsub.f32 1.0, %v573_v53 }
 0x794   : > { %v575_v56 = vmul.f32 %v794_v52, %v574_v54 }
 0x796   : > { %v576_v58 = vadd.f32 %v794_v52, %v575_v56 }
 0x798   : > { %v580_v60 = vsel %vm579_vm0, %v794_v52, %v576_v58 }
 0x799   : > { %v585_v61 = vsel %vm582_vm2, %v584_v12, %v580_v60 }
 0x79a   : > { %v608_v62 = vmul.f32 %v606_v59, %v585_v61  ;;  %v600_v4 = vsub.f32 1.0, %v585_v61 }
 0x7d8   : > { %v591_v63 = vpop.permute.xlu2 %590 }
 0x7d9   : > { %v593_v0 = vmul.f32 %v591_v63, %v585_v61 }
 0x7db   : > { %595 = vrot.lane.b32.xlu0 %v593_v0, %s877_s27 }
 0x84d   : > { %v596_v1 = vpop.permute.xlu0 %595 }
 0x84e   : > { %v598_v2 = vadd.f32 %v596_v1, %v968_v17 }
 0x850   : > { %795 = vtanh.f32 %v598_v2 }
 0x856   : > { %v796_v3 = vpop.eup %795 }
 0x857   : > { %602 = vrot.lane.b32.xlu1 %v796_v3, %s878_s8 }
 0x8c9   : > { %v603_v5 = vpop.permute.xlu1 %602 }
 0x8ca   : > { %v605_v6 = vmul.f32 %v603_v5, %v600_v4 }
 0x8cc   : > { %v609_v7 = vadd.f32 %v608_v62, %v605_v6 }
 0x8ce   : > { %611 = vrot.lane.b32.xlu2 %v609_v7, %s878_s8 }
 0x925   : > { %619 = sbr.rel (%p732_p8) target bundleno = 2592 (0xa20), region = 60 }
 0x928   : > { %v612_v8 = vpop.permute.xlu2 %611 }
 0x929   : > { %615 = vst.msk [vmem:[#allocation2 - $0x6] sm:$0xc0] %vm614_vm3, %v612_v8 }
 0x92a   : > { %v628_v9 = vrot.slane %v609_v7, 6  ;;  %v623_v17 = vld [vmem:[%s1028_s5 + $0x18] sm:$0xff]  ;;  %v622_v10 = vld [vmem:[%s1028_s5 + $0x10] sm:$0xff]  ;;  %v621_v11 = vld [vmem:[%s1028_s5 + $0x8] sm:$0xff]  ;;  %vm653_vm4 = vcmask 123904  }
 0x92b   : > { %645 = vmatpush.msra.mxu0 %v623_v17  ;;  %v620_v13 = vld [vmem:[%s1028_s5] sm:$0xff] }
 0x92c   : > { %629 = vrot.lane.b32.xlu0 %v628_v9, %s879_s13  ;;  %v797_v15 = vld [vmem:[%s1029_s6] ss:$0 sm:$0xff] }
 0x92d   : > { %646 = vmatpush.msra.mxu0 %v622_v10 }
 0x92f   : > { %647 = vmatpush.msra.mxu0 %v621_v11 }
 0x931   : > { %648 = vmatpush.msra.mxu0 %v620_v13 }
 0x99e   : > { %v630_v14 = vpop.permute.xlu0 %629 }
 0x99f   : > { %733 = vmatmul.msk.f32.vlgmr.msra.gmra.mxu0 %vm294_vm1, %v630_v14 }
 0xa1c   : > { %v650_v16 = vpop.f32.mrf.mxu0 }
 0xa1d   : > { %v651_v18 = vadd.f32 %v797_v15, %v650_v16 }
 0xa1f   : > { %654 = vst.msk [vmem:[#allocation6] sm:$0x3] %vm653_vm4, %v651_v18 }
 0xa20 PF: > { %p752_p9 = scmp.eq.s32.totalorder %s930_s28, 1  ;;  %s880_s20 = smov [#allocation6]  }
 0xa21   : > { %s661_s21 = sshll.u32 %s880_s20, 4  ;;  %s663_s25 = sshll.u32 %s1030_s7, 4  ;;  %s662_s21 = int_to_ptr.vmem [resolvable:$true] %s661_s21  ;;  %s664_s25 = int_to_ptr.hbm [resolvable:$true] %s663_s25 }
 0xa22   : > { %743 = dma.vmem_to_hbm [thread:$0]  (%p752_p9), %s662_s21, 32, %s664_s25, [#allocation5]  }
 0xa23   : > { %865 = dma.done.wait (%p752_p9), [#allocation5], 32  }
 0xa24   : > { %867 = vsyncadd (%p752_p9), [#allocation5], 4294967264 }
 0xa25 PF: > { %s19_s24 = sadd.s32 1, %s870_s24  }
 0xa26   : > { %p16_p10 = scmp.ge.s32.totalorder %s19_s24, 4  }
 0xa28   :  { %18 = sbr.rel (!%p16_p10) target bundleno = 2 (0x2), region = 88 }
 0xa2d   :  { %677 = vsyncpa [#allocation4], 1 }
 0xa2e   :  { %679 = vsyncpa [#allocation4 + $0x1], 1 }
 0xa2f   :  { %680 = vsyncpa [#allocation5], 1 }
 0xa30   :  { %682 = vsyncpa [#allocation5 + $0x1], 1 }

</bundles_post_ra>
